<compile_context>
chip_gen: v7x
topology: tpu7x:2x2x1
jax: 0.10.0
libtpu: 0.0.40
codegen_flags: <defaults>
</compile_context>

<pallas_src>
import jax
import jax.numpy as jnp
from jax.experimental import pallas as pl
from jax.experimental.pallas import tpu as pltpu


def _round_up(v, m):
    return ((v + m - 1) // m) * m


def domain_clf_kernel(x_ref, w12_ref, b12_ref, w3_ref, b3_ref, o_ref):
    # x: (TM, Din) f32 or bf16; w12: (Din, H) same dtype; biases / w3 in f32.
    x = x_ref[...]

    # Folded conv(1x1) + Linear1 (f32 accumulation on the MXU), then ReLU.
    h = jnp.dot(x, w12_ref[...], preferred_element_type=jnp.float32) + b12_ref[...]
    h = jnp.maximum(h, 0.0)

    # Linear2 straight into the true (unpadded) class dim.
    logits = jnp.dot(h, w3_ref[...], preferred_element_type=jnp.float32) + b3_ref[...]

    # Numerically-stable softmax over the last dim.  Exact division: the kernel
    # is HBM-bound so the extra VPU/EUP work is free and rows sum to 1 exactly.
    m = jnp.max(logits, axis=-1, keepdims=True)
    e = jnp.exp(logits - m)
    denom = jnp.sum(e, axis=-1, keepdims=True)
    o_ref[...] = (e / denom).astype(o_ref.dtype)


def domain_clf_forward(x_nchw, params, *, tm=None,
                       vmem_tile_budget=6 * 1024 * 1024):
    """x_nchw: (B, input_dim, 1, 1).  Returns (B, num_clients) softmax probs (f32)."""
    w1, b1, w2, b2, w3, b3 = params
    B, din = x_nchw.shape[0], x_nchw.shape[1]
    assert x_nchw.shape[2] == 1 and x_nchw.shape[3] == 1, (
        "Flatten -> Linear(C1, ...) requires 1x1 spatial input")
    hid = w2.shape[1]
    nc = w3.shape[1]

    # Glue: squeeze the trivial spatial dims (free under jit, no data movement).
    x2d = x_nchw.reshape(B, din)
    # Use bf16 operands only if the caller already holds bf16 activations;
    # casting f32 -> bf16 here would add an extra HBM pass on a mem-bound kernel.
    op_dtype = jnp.bfloat16 if x2d.dtype == jnp.bfloat16 else jnp.float32
    x2d = x2d.astype(op_dtype)

    # Fold conv + Linear1 (two affine maps, nothing in between).  Weights are
    # tiny, so this fold / cast cost is negligible next to the x stream.
    w1f, w2f = w1.astype(jnp.float32), w2.astype(jnp.float32)
    w12 = (w1f @ w2f).astype(op_dtype)                                   # (Din, H)
    b12 = (b1.astype(jnp.float32) @ w2f + b2.astype(jnp.float32)).reshape(1, hid)
    w3f = w3.astype(jnp.float32)                                         # (H, NC)
    b3f = b3.astype(jnp.float32).reshape(1, nc)                          # (1, NC)

    # --- batch-tile sizing ---------------------------------------------------
    # Double-buffered x tile + output tile per grid step; target a budget that
    # stays under v5e's 16 MiB scoped-VMEM default (also << v7x's 32 MiB scoped).
    itemsize = jnp.dtype(op_dtype).itemsize
    bytes_per_row = din * itemsize + nc * 4
    if tm is None:
        tm = max(256, (vmem_tile_budget // (2 * bytes_per_row)) // 256 * 256)
    n_steps = pl.cdiv(B, tm)
    # Keep >= 2 grid steps when there is enough work so v7x's second TensorCore
    # participates via dimension_semantics=("parallel",).
    if n_steps == 1 and B >= 2048:
        n_steps = 2
    tm_eff = min(_round_up(pl.cdiv(B, n_steps), 16), _round_up(B, 8))
    grid = (pl.cdiv(B, tm_eff),)

    # Compiler params; only raise the scoped-VMEM limit if we would exceed the
    # smallest default (v5e 16 MiB) -- with the budget above we normally don't.
    vmem_est = (2 * tm_eff * bytes_per_row
                + din * hid * itemsize + (hid + hid * nc + nc) * 4)
    cparams = dict(dimension_semantics=("parallel",))
    if vmem_est > 14 * 1024 * 1024:
        cparams["vmem_limit_bytes"] = int(vmem_est * 3 // 2)

    cost = pl.CostEstimate(
        flops=2 * B * din * hid + 2 * B * hid * nc,
        transcendentals=B * nc,
        bytes_accessed=(B * din * itemsize                 # x read
                        + din * hid * itemsize             # w12
                        + (hid + hid * nc + nc) * 4        # b12, w3, b3
                        + B * nc * 4),                     # output write
    )

    out = pl.pallas_call(
        domain_clf_kernel,
        out_shape=jax.ShapeDtypeStruct((B, nc), jnp.float32),
        grid=grid,
        in_specs=[
            pl.BlockSpec((tm_eff, din), lambda i: (i, 0)),   # x tile (pipelined)
            pl.BlockSpec((din, hid), lambda i: (0, 0)),      # W12 resident
            pl.BlockSpec((1, hid), lambda i: (0, 0)),        # b12 resident
            pl.BlockSpec((hid, nc), lambda i: (0, 0)),       # W3 resident (unpadded)
            pl.BlockSpec((1, nc), lambda i: (0, 0)),         # b3 resident
        ],
        out_specs=pl.BlockSpec((tm_eff, nc), lambda i: (i, 0)),
        compiler_params=pltpu.CompilerParams(**cparams),
        cost_estimate=cost,
    )(x2d, w12, b12, w3f, b3f)

    # No padded classes and no padded batch rows -> nothing to slice away.
    return out


def init_params(key, input_dim, num_clients, num_image, ratio=16):
    """Deterministic synthetic parameters (PyTorch-style uniform fan_in init)."""
    c1 = num_image // num_clients
    hid = c1 // ratio
    ks = jax.random.split(key, 6)

    def unif(k, shape, fan_in):
        bound = 1.0 / jnp.sqrt(fan_in)
        return jax.random.uniform(k, shape, jnp.float32, -bound, bound)

    # Conv2d(input_dim, c1, 1): weight (c1, input_dim, 1, 1) -> stored (input_dim, c1)
    w1 = unif(ks[0], (input_dim, c1), input_dim)
    b1 = unif(ks[1], (1, c1), input_dim)
    # Linear(c1, hid): weight (hid, c1) -> stored (c1, hid)
    w2 = unif(ks[2], (c1, hid), c1)
    b2 = unif(ks[3], (1, hid), c1)
    # Linear(hid, num_clients): weight (nc, hid) -> stored (hid, nc)
    w3 = unif(ks[4], (hid, num_clients), hid)
    b3 = unif(ks[5], (1, num_clients), hid)
    return (w1, b1, w2, b2, w3, b3)


def reference_forward(x_nchw, params):
    w1, b1, w2, b2, w3, b3 = params
    x = x_nchw.astype(jnp.float32).reshape(x_nchw.shape[0], -1)
    h1 = x @ w1 + b1                       # 1x1 conv == dense
    h2 = jnp.maximum(h1 @ w2 + b2, 0.0)    # Linear + ReLU
    logits = h2 @ w3 + b3                  # Linear
    return jax.nn.softmax(logits, axis=-1)


if __name__ == "__main__":
    # Small, forward-consistent shapes:
    B = 8
    input_dim = 16
    num_clients = 4
    num_image = 512          # -> C1 = 128, hidden = 8
    ratio = 16

    key = jax.random.PRNGKey(0)
    kx, kp = jax.random.split(key)
    x = jax.random.normal(kx, (B, input_dim, 1, 1), dtype=jnp.float32)
    params = init_params(kp, input_dim, num_clients, num_image, ratio)

    ref = reference_forward(x, params)

    # f32 path (matches the PyTorch module's dtype exactly, up to the conv+Linear1 fold).
    out = jax.block_until_ready(domain_clf_forward(x, params))
    assert out.shape == (B, num_clients)
    assert jnp.allclose(out, ref, atol=1e-3, rtol=1e-3)
    assert jnp.allclose(jnp.sum(out, axis=-1), 1.0, atol=1e-5)

    # bf16-operand path: halves the dominant x HBM read on v6e/v7x when the
    # caller already holds bf16 activations (cast here only to exercise it).
    out_bf16 = jax.block_until_ready(domain_clf_forward(x.astype(jnp.bfloat16), params))
    assert out_bf16.shape == (B, num_clients)
    assert jnp.allclose(out_bf16, ref, atol=5e-3)

    print("KERNEL_OK")
</pallas_src>

<mosaic_0001>
module attributes {stable_mosaic.version = 11 : i64} {
  func.func @domain_clf_kernel(%arg0: i32, %arg1: memref<8x16xf32, #tpu.memory_space<vmem>>, %arg2: memref<16x8xf32, #tpu.memory_space<vmem>>, %arg3: memref<1x8xf32, #tpu.memory_space<vmem>>, %arg4: memref<8x4xf32, #tpu.memory_space<vmem>>, %arg5: memref<1x4xf32, #tpu.memory_space<vmem>>, %arg6: memref<8x4xf32, #tpu.memory_space<vmem>>) attributes {dimension_semantics = [#tpu.dimension_semantics<parallel>], iteration_bounds = array<i64: 1>, scalar_prefetch = 0 : i64, scratch_operands = 0 : i64, tpu.core_type = #tpu.core_type<tc>, window_params = [{transform_indices = @transform_0, window_bounds = array<i64: 8, 16>}, {pipeline_mode = #tpu.pipeline_mode<synchronous>, transform_indices = @transform_1, window_bounds = array<i64: 16, 8>}, {pipeline_mode = #tpu.pipeline_mode<synchronous>, transform_indices = @transform_2, window_bounds = array<i64: 1, 8>}, {pipeline_mode = #tpu.pipeline_mode<synchronous>, transform_indices = @transform_3, window_bounds = array<i64: 8, 4>}, {pipeline_mode = #tpu.pipeline_mode<synchronous>, transform_indices = @transform_4, window_bounds = array<i64: 1, 4>}, {transform_indices = @transform_5, window_bounds = array<i64: 8, 4>}]} {
    %c0 = arith.constant 0 : index
    %c0_0 = arith.constant 0 : index
    %0 = vector.load %arg1[%c0, %c0_0] : memref<8x16xf32, #tpu.memory_space<vmem>>, vector<8x16xf32>
    %c0_1 = arith.constant 0 : index
    %c0_2 = arith.constant 0 : index
    %1 = vector.load %arg2[%c0_1, %c0_2] : memref<16x8xf32, #tpu.memory_space<vmem>>, vector<16x8xf32>
    %cst = arith.constant dense<0.000000e+00> : vector<8x8xf32>
    %2 = tpu.matmul %0, %1, %cst {dimension_numbers = #tpu.dot_dimension_numbers<[1], [0], [0], [1], [0, 0, 1, 1], [], []>} : vector<8x16xf32>, vector<16x8xf32>, vector<8x8xf32> -> vector<8x8xf32>
    %c0_3 = arith.constant 0 : index
    %c0_4 = arith.constant 0 : index
    %3 = vector.load %arg3[%c0_3, %c0_4] : memref<1x8xf32, #tpu.memory_space<vmem>>, vector<1x8xf32>
    %4 = vector.broadcast %3 : vector<1x8xf32> to vector<8x8xf32>
    %5 = arith.addf %2, %4 : vector<8x8xf32>
    %cst_5 = arith.constant 0.000000e+00 : f32
    %6 = vector.broadcast %cst_5 : f32 to vector<8x8xf32>
    %7 = arith.maximumf %5, %6 : vector<8x8xf32>
    %c0_6 = arith.constant 0 : index
    %c0_7 = arith.constant 0 : index
    %8 = vector.load %arg4[%c0_6, %c0_7] : memref<8x4xf32, #tpu.memory_space<vmem>>, vector<8x4xf32>
    %cst_8 = arith.constant dense<0.000000e+00> : vector<8x4xf32>
    %9 = tpu.matmul %7, %8, %cst_8 {dimension_numbers = #tpu.dot_dimension_numbers<[1], [0], [0], [1], [0, 0, 1, 1], [], []>} : vector<8x8xf32>, vector<8x4xf32>, vector<8x4xf32> -> vector<8x4xf32>
    %c0_9 = arith.constant 0 : index
    %c0_10 = arith.constant 0 : index
    %10 = vector.load %arg5[%c0_9, %c0_10] : memref<1x4xf32, #tpu.memory_space<vmem>>, vector<1x4xf32>
    %11 = vector.broadcast %10 : vector<1x4xf32> to vector<8x4xf32>
    %12 = arith.addf %9, %11 : vector<8x4xf32>
    %cst_11 = arith.constant dense<0xFF800000> : vector<8xf32>
    %13 = vector.multi_reduction <maximumf>, %12, %cst_11 [1] : vector<8x4xf32> to vector<8xf32>
    %14 = vector.shape_cast %13 : vector<8xf32> to vector<8x1xf32>
    %15 = vector.broadcast %14 : vector<8x1xf32> to vector<8x4xf32>
    %16 = arith.subf %12, %15 : vector<8x4xf32>
    %17 = math.exp %16 : vector<8x4xf32>
    %cst_12 = arith.constant dense<0.000000e+00> : vector<8xf32>
    %18 = vector.multi_reduction <add>, %17, %cst_12 [1] : vector<8x4xf32> to vector<8xf32>
    %19 = vector.shape_cast %18 : vector<8xf32> to vector<8x1xf32>
    %20 = vector.broadcast %19 : vector<8x1xf32> to vector<8x4xf32>
    %21 = arith.divf %17, %20 : vector<8x4xf32>
    %c0_13 = arith.constant 0 : index
    %c0_14 = arith.constant 0 : index
    %22 = vector.load %arg6[%c0_13, %c0_14] : memref<8x4xf32, #tpu.memory_space<vmem>>, vector<8x4xf32>
    tpu.vector_store %arg6[%c0_13, %c0_14], %21 {strides = array<i32>} : memref<8x4xf32, #tpu.memory_space<vmem>>, vector<8x4xf32>,
    return
  }
  func.func @transform_0(%arg0: i32) -> (i32, i32) {
    %c0_i32 = arith.constant 0 : i32
    %c0_i32_0 = arith.constant 0 : i32
    return %arg0, %c0_i32 : i32, i32
  }
  func.func @transform_1(%arg0: i32) -> (i32, i32) {
    %c0_i32 = arith.constant 0 : i32
    %c0_i32_0 = arith.constant 0 : i32
    %c0_i32_1 = arith.constant 0 : i32
    return %c0_i32, %c0_i32_0 : i32, i32
  }
  func.func @transform_2(%arg0: i32) -> (i32, i32) {
    %c0_i32 = arith.constant 0 : i32
    %c0_i32_0 = arith.constant 0 : i32
    %c0_i32_1 = arith.constant 0 : i32
    return %c0_i32, %c0_i32_0 : i32, i32
  }
  func.func @transform_3(%arg0: i32) -> (i32, i32) {
    %c0_i32 = arith.constant 0 : i32
    %c0_i32_0 = arith.constant 0 : i32
    %c0_i32_1 = arith.constant 0 : i32
    return %c0_i32, %c0_i32_0 : i32, i32
  }
  func.func @transform_4(%arg0: i32) -> (i32, i32) {
    %c0_i32 = arith.constant 0 : i32
    %c0_i32_0 = arith.constant 0 : i32
    %c0_i32_1 = arith.constant 0 : i32
    return %c0_i32, %c0_i32_0 : i32, i32
  }
  func.func @transform_5(%arg0: i32) -> (i32, i32) {
    %c0_i32 = arith.constant 0 : i32
    %c0_i32_0 = arith.constant 0 : i32
    return %arg0, %c0_i32 : i32, i32
  }
}

</mosaic_0001>

<bundles_post_ra>
// kernel: tpu_custom_call.1
= control target key start
LH: loop header
LB: loop body
LE: loop exit
PB: predicated region body
PF: predicated region fallthrough
CT: control target
= control target key end

     0   :  { %v235_v0 = vmov 0.0|0.0   ;;  %vm236_vm0 = vmmov 0   ;;  %v237_v3 = vmov 0.0   ;;  %vm30_vm1 = vcmask 130048   ;;  %s292_s1 = inlined_call_operand.vmem [shape: f32[16,8], index: 1, kind: input, shape index: {}]   ;;  %s293_s0 = inlined_call_operand.vmem [shape: f32[8,16], index: 0, kind: input, shape index: {}]   ;;  %s294_s3 = inlined_call_operand.vmem [shape: f32[8,4], index: 3, kind: input, shape index: {}]   ;;  %s295_s2 = inlined_call_operand.vmem [shape: f32[1,8], index: 2, kind: input, shape index: {}]   ;;  %s296_s4 = inlined_call_operand.vmem [shape: f32[1,4], index: 4, kind: input, shape index: {}]   ;;  %s297_s5 = inlined_call_operand.vmem [shape: f32[8,4], index: 5, kind: output, shape index: {}]  }
   0x1   :  { %225 = vmatprep.subr.bf16.mxu0 %v235_v0  ;;  %v21_v1 = vld [vmem:[%s292_s1] sm:$0xff]  ;;  %v22_v2 = vld [vmem:[%s292_s1 + $0x8] sm:$0xff]  ;;  %217 = vmatprep.mubr.msk.f32.mxu0 %vm236_vm0, %v237_v3  ;;  %vm113_vm2 = vcmask 64512   ;;  %vm187_vm3 = vcmask 31744  }
   0x2   :  { %v226_v4 = vpack.c.bf16 %v22_v2, %v21_v1  ;;  %220 = vmatprep.subr.mxu1 %v237_v3  ;;  %222 = vmatprep.mubr.msk.f32.mxu1 %vm236_vm0, %v237_v3  ;;  %v20_v5 = vld [vmem:[%s293_s0] sm:$0xff] }
   0x3   :  { %v105_v6 = vld [vmem:[%s294_s3] sm:$0xff] }
   0x4   :  { %227 = vmatpush3.bf16.msra.mxu0 %v226_v4  ;;  %221 = vmatpush3.msra.mxu1 %v105_v6  ;;  %v204_v7 = vld [vmem:[%s295_s2] ss:$0 sm:$0xff] }
   0x5   :  { %v206_v12 = vld [vmem:[%s296_s4] ss:$0 sm:$0xff] }
   0x7   :  { %218 = vmatmul.mubr.msk.f32.vlgmr.msra.gmra.mrb[0].mxu0 %vm30_vm1, %v20_v5 }
  0xda   :  { %v100_v8 = vpop.f32.mrb[0].mxu0 }
  0xdb   :  { %v101_v9 = vadd.f32 %v204_v7, %v100_v8  ;;  %v219_v10 = vpop.f32.mrb[1].mxu0 }
  0xdd   :  { %v104_v11 = vmax.f32 %v101_v9, 0.0 }
  0xdf   :  { %223 = vmatmul.mubr.msk.f32.vlgmr.msra.gmra.mrb[0].mxu1 %vm113_vm2, %v104_v11 }
 0x1b2   :  { %v183_v13 = vpop.f32.mrb[0].mxu1 }
 0x1b3   :  { %v184_v14 = vadd.f32 %v206_v12, %v183_v13  ;;  %v224_v15 = vpop.f32.mrb[1].mxu1 }
 0x1b5   :  { %v188_v16 = vsel %vm187_vm3, %v184_v14, -inf }
 0x1b6   :  { %189 = vmax.xlane.f32.xlu0 %v188_v16 }
 0x243   :  { %v190_v17 = vpop.xlane.xlu0 %189 }
 0x244   :  { %v191_v18 = vsub.f32 %v184_v14, %v190_v17 }
 0x246   :  { %v192_v19 = vmul.f32 1.442695, %v191_v18 }
 0x248   :  { %231 = vpow2.f32 %v192_v19 }
 0x252   :  { %v232_v20 = vpop.eup %231 }
 0x253   :  { %v194_v21 = vsel %vm187_vm3, %v232_v20, 0.0 }
 0x254   :  { %195 = vadd.xlane.f32.xlu0 %v194_v21 }
 0x2e1   :  { %v196_v22 = vpop.xlane.xlu0 %195 }
 0x2e2   :  { %233 = vrcp.f32 %v196_v22 }
 0x2ec   :  { %v234_v23 = vpop.eup %233 }
 0x2ed   :  { %v198_v24 = vmul.f32 %v234_v23, %v232_v20 }
 0x2ef   :  { %199 = vst.msk [vmem:[%s297_s5] sm:$0xff] %vm187_vm3, %v198_v24 }

</bundles_post_ra>
